<compile_context>
chip_gen: v6e
topology: v6e:2x2x1
jax: 0.10.0
libtpu: 0.0.40
codegen_flags: <defaults>
</compile_context>

<pallas_src>
import math

import jax
import jax.numpy as jnp
from jax.experimental import pallas as pl
from jax.experimental.pallas import tpu as pltpu

D_MODEL = 32
TARGET_VOCAB = 128   # lane-dense output width (multiple of 128)


def _round_up(x, m):
    return ((x + m - 1) // m) * m


# ----------------------------- Pallas kernel --------------------------------

def generator_kernel(x_ref, w_ref, b_ref, o_ref):
    """Fused Linear + log_softmax over the last dim, for one row-tile.

    x_ref: (TM, D)   w_ref: (D, V)   b_ref: (1, V)   o_ref: (TM, V)
    """
    # logits = x @ W + b  (MXU matmul, f32 accumulation; x/W stay native dtype)
    logits = jnp.dot(x_ref[...], w_ref[...], preferred_element_type=jnp.float32)
    logits = logits + b_ref[...].astype(jnp.float32)
    # numerically-stable log-softmax along the lane axis (exp/log -> EUP)
    m = jnp.max(logits, axis=-1, keepdims=True)
    shifted = logits - m
    lse = jnp.log(jnp.sum(jnp.exp(shifted), axis=-1, keepdims=True))
    o_ref[...] = (shifted - lse).astype(o_ref.dtype)


# ----------------------------- wrapper ---------------------------------------

def generator_forward(x, w, b, *, tile_m=1024):
    """x: (..., D); w: (D, V); b: (V,) -> log-probs (..., V) in float32.

    tile_m ~1K-2K is the sweet spot on v5e/v6e; bump to 4K-8K on v7x to
    amortize per-step overhead against its 3.2 TB/s HBM.
    """
    lead = x.shape[:-1]
    D = x.shape[-1]
    V = w.shape[1]
    M = math.prod(lead) if lead else 1
    x2 = x.reshape(M, D)

    # Pick a tile that is a multiple of 8 sublanes and pad M up to it so every
    # grid step moves full, unmasked tiles (padded rows are sliced off below).
    tm = min(tile_m, _round_up(max(M, 1), 8))
    m_pad = _round_up(M, tm)
    if m_pad != M:
        x2 = jnp.pad(x2, ((0, m_pad - M), (0, 0)))

    grid = (m_pad // tm,)
    bytes_accessed = (x2.size * x2.dtype.itemsize          # x read
                      + w.size * w.dtype.itemsize          # W read (once)
                      + V * b.dtype.itemsize               # b read (once)
                      + m_pad * V * 4)                     # f32 output write

    out = pl.pallas_call(
        generator_kernel,
        out_shape=jax.ShapeDtypeStruct((m_pad, V), jnp.float32),
        grid=grid,
        in_specs=[
            pl.BlockSpec((tm, D), lambda i: (i, 0)),   # activation row-tile
            pl.BlockSpec((D, V), lambda i: (0, 0)),    # weights, VMEM-resident
            pl.BlockSpec((1, V), lambda i: (0, 0)),    # bias, VMEM-resident
        ],
        out_specs=pl.BlockSpec((tm, V), lambda i: (i, 0)),  # lane-dense store
        compiler_params=pltpu.CompilerParams(
            dimension_semantics=("parallel",)),        # v7x: shard rows over 2 TCs
        cost_estimate=pl.CostEstimate(
            flops=2 * m_pad * D * V,
            transcendentals=m_pad * (V + 1),
            bytes_accessed=bytes_accessed),
    )(x2, w, b.reshape(1, V))

    out = out[:M]
    return out.reshape(lead + (V,))


# ----------------------------------- main ------------------------------------

if __name__ == "__main__":
    B, S = 2, 8
    key = jax.random.PRNGKey(0)
    k_x, k_w, k_b = jax.random.split(key, 3)

    x = jax.random.normal(k_x, (B, S, D_MODEL), jnp.float32)
    # nn.Linear(d_model, target_vocab): stored as (in, out) for x @ W
    w = 0.02 * jax.random.normal(k_w, (D_MODEL, TARGET_VOCAB), jnp.float32)
    b = 0.01 * jax.random.normal(k_b, (TARGET_VOCAB,), jnp.float32)

    out = generator_forward(x, w, b)
    out = jax.block_until_ready(out)

    assert out.shape == (B, S, TARGET_VOCAB)
    assert bool(jnp.all(jnp.isfinite(out)))
    # reference: plain-JAX linear + log_softmax
    ref = jax.nn.log_softmax(x @ w + b, axis=-1)
    assert bool(jnp.allclose(out, ref, atol=1e-5, rtol=1e-5))
    # log-softmax rows must normalize: logsumexp == 0
    assert bool(jnp.allclose(jax.scipy.special.logsumexp(out, axis=-1), 0.0, atol=1e-5))

    # also exercise the padded / multi-tile path (M not a multiple of 8)
    x_odd = jax.random.normal(k_x, (3, 7, D_MODEL), jnp.float32)
    out_odd = jax.block_until_ready(generator_forward(x_odd, w, b, tile_m=8))
    ref_odd = jax.nn.log_softmax(x_odd @ w + b, axis=-1)
    assert bool(jnp.allclose(out_odd, ref_odd, atol=1e-5, rtol=1e-5))

    print("KERNEL_OK")
</pallas_src>

<mosaic_0001>
module attributes {stable_mosaic.version = 11 : i64} {
  func.func @generator_kernel(%arg0: i32, %arg1: memref<16x32xf32, #tpu.memory_space<vmem>>, %arg2: memref<32x128xf32, #tpu.memory_space<vmem>>, %arg3: memref<1x128xf32, #tpu.memory_space<vmem>>, %arg4: memref<16x128xf32, #tpu.memory_space<vmem>>) attributes {dimension_semantics = [#tpu.dimension_semantics<parallel>], iteration_bounds = array<i64: 1>, scalar_prefetch = 0 : i64, scratch_operands = 0 : i64, tpu.core_type = #tpu.core_type<tc>, window_params = [{transform_indices = @transform_0, window_bounds = array<i64: 16, 32>}, {pipeline_mode = #tpu.pipeline_mode<synchronous>, transform_indices = @transform_1, window_bounds = array<i64: 32, 128>}, {pipeline_mode = #tpu.pipeline_mode<synchronous>, transform_indices = @transform_2, window_bounds = array<i64: 1, 128>}, {transform_indices = @transform_3, window_bounds = array<i64: 16, 128>}]} {
    %c0 = arith.constant 0 : index
    %c0_0 = arith.constant 0 : index
    %0 = vector.load %arg1[%c0, %c0_0] : memref<16x32xf32, #tpu.memory_space<vmem>>, vector<16x32xf32>
    %c0_1 = arith.constant 0 : index
    %c0_2 = arith.constant 0 : index
    %1 = vector.load %arg2[%c0_1, %c0_2] : memref<32x128xf32, #tpu.memory_space<vmem>>, vector<32x128xf32>
    %cst = arith.constant dense<0.000000e+00> : vector<16x128xf32>
    %2 = tpu.matmul %0, %1, %cst {dimension_numbers = #tpu.dot_dimension_numbers<[1], [0], [0], [1], [0, 0, 1, 1], [], []>} : vector<16x32xf32>, vector<32x128xf32>, vector<16x128xf32> -> vector<16x128xf32>
    %c0_3 = arith.constant 0 : index
    %c0_4 = arith.constant 0 : index
    %3 = vector.load %arg3[%c0_3, %c0_4] : memref<1x128xf32, #tpu.memory_space<vmem>>, vector<1x128xf32>
    %4 = vector.broadcast %3 : vector<1x128xf32> to vector<16x128xf32>
    %5 = arith.addf %2, %4 : vector<16x128xf32>
    %cst_5 = arith.constant dense<0xFF800000> : vector<16xf32>
    %6 = vector.multi_reduction <maximumf>, %5, %cst_5 [1] : vector<16x128xf32> to vector<16xf32>
    %7 = vector.shape_cast %6 : vector<16xf32> to vector<16x1xf32>
    %8 = vector.broadcast %7 : vector<16x1xf32> to vector<16x128xf32>
    %9 = arith.subf %5, %8 : vector<16x128xf32>
    %10 = math.exp %9 : vector<16x128xf32>
    %cst_6 = arith.constant dense<0.000000e+00> : vector<16xf32>
    %11 = vector.multi_reduction <add>, %10, %cst_6 [1] : vector<16x128xf32> to vector<16xf32>
    %12 = vector.shape_cast %11 : vector<16xf32> to vector<16x1xf32>
    %13 = math.log %12 : vector<16x1xf32>
    %14 = vector.broadcast %13 : vector<16x1xf32> to vector<16x128xf32>
    %15 = arith.subf %9, %14 : vector<16x128xf32>
    %c0_7 = arith.constant 0 : index
    %c0_8 = arith.constant 0 : index
    %16 = vector.load %arg4[%c0_7, %c0_8] : memref<16x128xf32, #tpu.memory_space<vmem>>, vector<16x128xf32>
    tpu.vector_store %arg4[%c0_7, %c0_8], %15 {strides = array<i32>} : memref<16x128xf32, #tpu.memory_space<vmem>>, vector<16x128xf32>,
    return
  }
  func.func @transform_0(%arg0: i32) -> (i32, i32) {
    %c0_i32 = arith.constant 0 : i32
    %c0_i32_0 = arith.constant 0 : i32
    return %arg0, %c0_i32 : i32, i32
  }
  func.func @transform_1(%arg0: i32) -> (i32, i32) {
    %c0_i32 = arith.constant 0 : i32
    %c0_i32_0 = arith.constant 0 : i32
    %c0_i32_1 = arith.constant 0 : i32
    return %c0_i32, %c0_i32_0 : i32, i32
  }
  func.func @transform_2(%arg0: i32) -> (i32, i32) {
    %c0_i32 = arith.constant 0 : i32
    %c0_i32_0 = arith.constant 0 : i32
    %c0_i32_1 = arith.constant 0 : i32
    return %c0_i32, %c0_i32_0 : i32, i32
  }
  func.func @transform_3(%arg0: i32) -> (i32, i32) {
    %c0_i32 = arith.constant 0 : i32
    %c0_i32_0 = arith.constant 0 : i32
    return %arg0, %c0_i32 : i32, i32
  }
}

</mosaic_0001>

<bundles_post_ra>
// kernel: tpu_custom_call.1
= control target key start
LH: loop header
LB: loop body
LE: loop exit
PB: predicated region body
PF: predicated region fallthrough
CT: control target
= control target key end

     0   :  { %8 = vsyncpa [#allocation3], 0  ;;  %s325_s0 = inlined_call_operand.hbm [shape: f32[16,32], index: 0, kind: input, shape index: {}]   ;;  %s326_s1 = inlined_call_operand.hbm [shape: f32[32,128], index: 1, kind: input, shape index: {}]   ;;  %s327_s2 = inlined_call_operand.vmem [shape: f32[1,128], index: 2, kind: input, shape index: {}]   ;;  %s328_s3 = inlined_call_operand.hbm [shape: f32[16,128], index: 3, kind: output, shape index: {}]  }
   0x1   :  { %9 = vsyncpa [#allocation6], 0 }
   0x2   :  { %10 = vsyncpa [#allocation4], 0  ;;  %s277_s12 = smov [#allocation2]  }
   0x3   :  { %s16_s13 = sshll.u32 %s277_s12, 4  ;;  %s17_s13 = int_to_ptr.vmem [resolvable:$true] %s16_s13 }
   0x4   :  { %s219_s14 = scalar_lea.vmem %s17_s13, 256  ;;  %p224_p1 = scmp.lt.s32.totalorder %s17_s13, %s17_s13 }
   0x5   :  { %p220_p0 = scmp.ne.s32.totalorder %s17_s13, %s219_s14  ;;  %p225_p2 = scmp.lt.s32.totalorder %s219_s14, %s219_s14 }
   0x7   :  { %p226_p3 = por %p225_p2, %p224_p1 }
   0x9   :  { %p227_p4 = pnand %p226_p3, %p220_p0 }
   0xb   :  { %230 = shalt.err (!%p227_p4)
}
   0xc   :  { %s278_s15 = smov 128   ;;  %s279_s16 = smov 8  }
   0xd   :  { %22 = dma.hbm_to_vmem [thread:$0]  %s325_s0, 256, %s17_s13, [#allocation3], %s278_s15, %s278_s15, %s279_s16  }
   0xe   :  { %s280_s19 = smov [#allocation5]  }
   0xf   :  { %s28_s20 = sshll.u32 %s280_s19, 4  ;;  %s29_s20 = int_to_ptr.vmem [resolvable:$true] %s28_s20 }
  0x10   :  { %s239_s21 = scalar_lea.vmem %s29_s20, 512  ;;  %p244_p6 = scmp.lt.s32.totalorder %s29_s20, %s29_s20 }
  0x11   :  { %p240_p5 = scmp.ne.s32.totalorder %s29_s20, %s239_s21  ;;  %p245_p7 = scmp.lt.s32.totalorder %s239_s21, %s239_s21 }
  0x13   :  { %p246_p8 = por %p245_p7, %p244_p6 }
  0x15   :  { %p247_p9 = pnand %p246_p8, %p240_p5 }
  0x17   :  { %250 = shalt.err (!%p247_p9)
}
  0x18   :  { %34 = dma.hbm_to_vmem [thread:$0]  %s326_s1, 512, %s29_s20, [#allocation6], %s278_s15, %s278_s15, %s279_s16  }
  0x19   :  { %271 = dma.done.wait [#allocation3], 256  }
  0x1a   :  { %272 = vsyncadd [#allocation3], 4294967040 }
  0x1b   :  { %273 = dma.done.wait [#allocation6], 512  }
  0x1c   :  { %274 = vsyncadd [#allocation6], 4294966784  ;;  %vm56_vm0 = vcmask 261120   ;;  %v48_v0 = vld [vmem:[#allocation5 + $0x18] sm:$0xff]  ;;  %v47_v1 = vld [vmem:[#allocation5 + $0x10] sm:$0xff] }
  0x1d   :  { %187 = vmatprep.subr.mxu0 %v48_v0  ;;  %v43_v2 = vld [vmem:[#allocation2] sm:$0xff]  ;;  %v46_v3 = vld [vmem:[#allocation5 + $0x8] sm:$0xff]  ;;  %v45_v4 = vld [vmem:[#allocation5] sm:$0xff] }
  0x1e   :  { %188 = vmatpush3.msra.mxu0 %v48_v0  ;;  %195 = vmatprep.mubr.msk.f32.mxu0 %vm56_vm0, %v43_v2  ;;  %v44_v5 = vld [vmem:[#allocation2 + $0x8] sm:$0xff]  ;;  %v178_v7 = vld [vmem:[%s327_s2] ss:$0 sm:$0xff]  ;;  %s281_s2 = smov [#allocation7]  }
  0x1f   :  { %189 = vmatprep.subr.mxu0 %v47_v1  ;;  %s165_s24 = sshll.u32 %s281_s2, 4  ;;  %s166_s24 = int_to_ptr.vmem [resolvable:$true] %s165_s24 }
  0x20   :  { %190 = vmatpush3.msra.mxu0 %v47_v1  ;;  %s251_s25 = scalar_lea.vmem %s166_s24, 256  ;;  %p256_p11 = scmp.lt.s32.totalorder %s166_s24, %s166_s24 }
  0x21   :  { %191 = vmatprep.subr.mxu0 %v46_v3  ;;  %p252_p10 = scmp.ne.s32.totalorder %s166_s24, %s251_s25  ;;  %p257_p12 = scmp.lt.s32.totalorder %s251_s25, %s251_s25 }
  0x22   :  { %192 = vmatpush3.msra.mxu0 %v46_v3 }
  0x23   :  { %193 = vmatprep.subr.mxu0 %v45_v4  ;;  %p258_p13 = por %p257_p12, %p256_p11 }
  0x24   :  { %194 = vmatpush3.msra.mxu0 %v45_v4 }
  0x25   :  { %196 = vmatmul.mubr.msk.f32.vlgmr.msra.gmra.mxu0 %vm56_vm0, %v44_v5  ;;  %p259_p0 = pnand %p258_p13, %p252_p10 }
  0xe5   :  { %v197_v6 = vpop.f32.mrf.mxu0 }
  0xe6   :  { %v135_v10 = vadd.f32 %v197_v6, %v178_v7 }
  0xe7   :  { %v129_v8 = vpop.f32.mrf.mxu0 }
  0xe8   :  { %v130_v9 = vadd.f32 %v178_v7, %v129_v8 }
  0xea   :  { %138 = vmax.xlane.f32.xlu0 %v130_v9 }
  0xee   :  { %140 = vmax.xlane.f32.xlu0 %v135_v10 }
 0x173   :  { %v139_v11 = vpop.xlane.xlu0 %138 }
 0x174   :  { %v142_v12 = vsub.f32 %v130_v9, %v139_v11 }
 0x176   :  { %v144_v13 = vmul.f32 1.442695, %v142_v12 }
 0x177   :  { %v141_v14 = vpop.xlane.xlu0 %140 }
 0x178   :  { %v143_v15 = vsub.f32 %v135_v10, %v141_v14  ;;  %203 = vpow2.f32 %v144_v13 }
 0x17a   :  { %v146_v16 = vmul.f32 1.442695, %v143_v15 }
 0x17c   :  { %205 = vpow2.f32 %v146_v16 }
 0x185   :  { %v204_v17 = vpop.eup %203 }
 0x186   :  { %148 = vadd.xlane.f32.xlu1 %v204_v17 }
 0x189   :  { %v206_v18 = vpop.eup %205 }
 0x18a   :  { %150 = vadd.xlane.f32.xlu1 %v206_v18 }
 0x20f   :  { %v149_v19 = vpop.xlane.xlu1 %148 }
 0x210   :  { %207 = vlog2.f32 %v149_v19 }
 0x213   :  { %v151_v20 = vpop.xlane.xlu1 %150 }
 0x214   :  { %209 = vlog2.f32 %v151_v20 }
 0x21d   :  { %v208_v21 = vpop.eup %207 }
 0x21e   :  { %v153_v22 = vmul.f32 0.6931472, %v208_v21 }
 0x220   :  { %v156_v23 = vsub.f32 %v142_v12, %v153_v22 }
 0x221   :  { %v210_v24 = vpop.eup %209 }
 0x222   :  { %v155_v25 = vmul.f32 0.6931472, %v210_v24  ;;  %158 = vst [vmem:[#allocation7] sm:$0xff] %v156_v23 }
 0x224   :  { %v157_v26 = vsub.f32 %v143_v15, %v155_v25 }
 0x226   :  { %159 = vst [vmem:[#allocation7 + $0x8] sm:$0xff] %v157_v26 }
 0x227   :  { %262 = shalt.err (!%p259_p0)
}
 0x228   :  { %171 = dma.vmem_to_hbm [thread:$0]  %s166_s24, 256, %s328_s3, [#allocation4], %s278_s15, %s278_s15, %s279_s16  }
 0x229   :  { %275 = dma.done.wait [#allocation4], 256  }
 0x22a   :  { %276 = vsyncadd [#allocation4], 4294967040 }
 0x22b   :  { %175 = vsyncpa [#allocation3], 1 }
 0x22c   :  { %176 = vsyncpa [#allocation6], 1 }
 0x22d   :  { %177 = vsyncpa [#allocation4], 1 }

</bundles_post_ra>
